<compile_context>
chip_gen: v6e
topology: v6e:2x2x1
jax: 0.10.0
libtpu: 0.0.40
codegen_flags: <defaults>
</compile_context>

<pallas_src>
import functools

import jax
import jax.numpy as jnp
from jax.experimental import pallas as pl
from jax.experimental.pallas import tpu as pltpu


# ---------------------------------------------------------------------------
# Generation-aware VMEM budgeting.
# ---------------------------------------------------------------------------
def _vmem_capacity_bytes():
    try:
        get_info = getattr(pltpu, "get_tpu_info", None)
        if get_info is not None:
            cap = getattr(get_info(), "vmem_capacity_bytes", None)
            if cap:
                return int(cap)
    except Exception:
        pass
    return 64 * 1024 * 1024                    # conservative default (v7x per-TC)


_VMEM_CAP = _vmem_capacity_bytes()
# ~64 MiB scoped limit on v5e/v6e (128 MiB physical), ~32 MiB on v7x (64 MiB/TC).
_VMEM_LIMIT = max(32 * 1024 * 1024, min(_VMEM_CAP // 2, 96 * 1024 * 1024))
_STREAM_BUDGET = _VMEM_LIMIT // 3              # budget for streamed, 2x-buffered blocks


def _round_up(x, m):
    return ((x + m - 1) // m) * m


def _choose_t_tile(T, B, H, budget_bytes):
    """T tile for kernel A.  enc + e_proj blocks (bf16, double-buffered) must fit
    the streaming budget.  Multiples of 128 when the sequence is split (keeps the
    (B, tT) scores output block lane-aligned); a single full tile otherwise."""
    bytes_per_row = 2 * 2 * B * H * 2          # 2 arrays * 2 buffers * bf16
    cap = max(8, budget_bytes // max(bytes_per_row, 1))
    t_full = _round_up(T, 8)
    if t_full <= min(cap, 512):
        return t_full, t_full                  # whole (padded) sequence in one tile
    t_tile = max(128, min(cap, 512) // 128 * 128)
    return t_tile, _round_up(T, t_tile)


def _choose_v_tile(V, H, B, budget_bytes):
    """V tile for the output projection: as large as the streaming budget allows,
    256-aligned (MXU-friendly on v6e/v7x, fine on v5e), used with a cdiv grid and
    a zero / -1e30 padded tail (no "tv must divide V" fallback)."""
    g = 256
    if _round_up(V, 128) <= g:
        return _round_up(V, 128)
    bytes_per_col = 2 * (2 * H * 2 + B * 4 + 4)   # bf16 (2H,tv) + f32 (B,tv) + bias, x2 bufs
    tv = max(g, (budget_bytes // max(bytes_per_col, 1)) // g * g)
    return min(tv, _round_up(V, g))


# ---------------------------------------------------------------------------
# Kernel A: attention (online softmax over T tiles) + context + GRU cell.
# Grid: (num_T_tiles,), "arbitrary" (carried softmax/context state in scratch).
# ---------------------------------------------------------------------------
def attn_gru_kernel(
    emb_ref, h_ref, enc_ref, eproj_ref,            # activations
    wah_ref, v_ref,                                # attention params
    wix_ref, wic_ref, whh_ref, bih_ref, bhh_ref,   # gate-fused GRU params
    scores_ref, hnew_ref, hc_ref,                  # outputs
    hproj_sc, m_sc, l_sc, ctx_sc,                  # VMEM scratch (persist over tiles)
    *, seq_len, t_tile,
):
    j = pl.program_id(0)
    n_t = pl.num_programs(0)
    h_prev = h_ref[...]                            # (B, H) f32

    @pl.when(j == 0)
    def _():
        # Online-softmax state + the T-invariant hidden-side projection.
        m_sc[...] = jnp.full_like(m_sc, -jnp.inf)
        l_sc[...] = jnp.zeros_like(l_sc)
        ctx_sc[...] = jnp.zeros_like(ctx_sc)
        hproj_sc[...] = jnp.dot(h_prev.astype(jnp.bfloat16), wah_ref[...],
                                preferred_element_type=jnp.float32)

    enc = enc_ref[...]                             # (B, tT, H) bf16, streamed
    e_proj = eproj_ref[...].astype(jnp.float32)    # (B, tT, H)
    # TODO(synk): on v6e/v7x the energy/relu math could stay bf16 (halves vreg
    # pressure); kept f32 so the identical kernel is correct/fast on v5e too.

    energy = jnp.maximum(hproj_sc[...][:, None, :] + e_proj, 0.0)       # (B, tT, H)
    # scores = energy . v.  The lane reduce is kept (instead of an MXU
    # (B*tT,H)x(H,1) dot) because the (B*tT,1)->(B,tT) relayout after such a dot
    # costs as much as the reduce and the reduce lowering is always supported.
    scores = jnp.sum(energy * v_ref[...], axis=-1)                      # (B, tT) f32

    # Mask the zero-padded tail of the (padded) sequence.
    b_dim, t_dim = scores.shape
    t_pos = j * t_tile + jax.lax.broadcasted_iota(jnp.int32, (b_dim, t_dim), 1)
    scores = jnp.where(t_pos < seq_len, scores, -1e30)
    scores_ref[...] = scores

    # Online softmax + context accumulation (flash-style across T tiles).
    m_prev = m_sc[...]
    m_new = jnp.maximum(m_prev, jnp.max(scores, axis=1, keepdims=True))
    alpha = jnp.exp(m_prev - m_new)
    p = jnp.exp(scores - m_new)                                         # (B, tT)
    l_sc[...] = alpha * l_sc[...] + jnp.sum(p, axis=1, keepdims=True)
    ctx_part = jnp.einsum("bqt,bth->bqh", p[:, None, :].astype(enc.dtype), enc,
                          preferred_element_type=jnp.float32)[:, 0, :]  # MXU
    ctx_sc[...] = alpha * ctx_sc[...] + ctx_part
    m_sc[...] = m_new

    # Epilogue on the last T tile: exact context normalization + GRU cell with
    # gate-fused matmuls (3 MXU pushes instead of 9).  PyTorch gate order (r,z,n).
    @pl.when(j == n_t - 1)
    def _():
        ctx = ctx_sc[...] / l_sc[...]                                   # (B, H) f32
        emb_bf = emb_ref[...].astype(jnp.bfloat16)
        gi = (jnp.dot(emb_bf, wix_ref[...], preferred_element_type=jnp.float32)
              + jnp.dot(ctx.astype(jnp.bfloat16), wic_ref[...],
                        preferred_element_type=jnp.float32)
              + bih_ref[...])                                           # (B, 3H)
        gh = (jnp.dot(h_prev.astype(jnp.bfloat16), whh_ref[...],
                      preferred_element_type=jnp.float32)
              + bhh_ref[...])                                           # (B, 3H)
        hdim = h_prev.shape[1]
        r = jax.nn.sigmoid(gi[:, 0:hdim] + gh[:, 0:hdim])
        z = jax.nn.sigmoid(gi[:, hdim:2 * hdim] + gh[:, hdim:2 * hdim])
        n = jnp.tanh(gi[:, 2 * hdim:3 * hdim] + r * gh[:, 2 * hdim:3 * hdim])
        h_new = (1.0 - z) * n + z * h_prev                              # (B, H)

        hnew_ref[...] = h_new
        # Fused [h_new | ctx] activation (bf16) feeding the V-tiled projection:
        # kernel B then needs a single dot per tile against the fused (2H, tv)
        # weight slab.
        hc_ref[:, 0:hdim] = h_new.astype(hc_ref.dtype)
        hc_ref[:, hdim:2 * hdim] = ctx.astype(hc_ref.dtype)


# ---------------------------------------------------------------------------
# Kernel B: output projection, V-tiled with a fused (2H, V) bf16 weight.
# Running (max, sum-exp) in VMEM scratch; final logsumexp emitted on last tile.
# ---------------------------------------------------------------------------
def out_proj_kernel(hc_ref, w_ref, b_ref, logits_ref, lse_ref, m_sc, l_sc):
    j = pl.program_id(0)

    @pl.when(j == 0)
    def _():
        m_sc[...] = jnp.full_like(m_sc, -jnp.inf)
        l_sc[...] = jnp.zeros_like(l_sc)

    logits = (jnp.dot(hc_ref[...], w_ref[...], preferred_element_type=jnp.float32)
              + b_ref[...])                                             # (B, tv) f32
    logits_ref[...] = logits

    m_prev = m_sc[...]
    m_new = jnp.maximum(m_prev, jnp.max(logits, axis=1, keepdims=True))
    alpha = jnp.exp(m_prev - m_new)
    l_sc[...] = alpha * l_sc[...] + jnp.sum(jnp.exp(logits - m_new), axis=1,
                                            keepdims=True)
    m_sc[...] = m_new

    @pl.when(j == pl.num_programs(0) - 1)
    def _():
        lse_ref[...] = m_sc[...] + jnp.log(l_sc[...])
    # TODO(synk): on v7x, split the V grid across the two TensorCores
    # (pltpu.CORE_PARALLEL leading axis) with per-core partial (m, l).


# ---------------------------------------------------------------------------
# Host-side, per-sequence / per-call-invariant preparation (hoisted out of the
# autoregressive decode step).
# ---------------------------------------------------------------------------
def prepare_encoder(encoder_outputs, params, stream_dtype=jnp.bfloat16):
    """(T,B,H)->(B,T,H) transpose + encoder-side attention projection + padding
    of T to a multiple of the chosen T tile.  Streamed operands stored bf16."""
    T, B, H = encoder_outputs.shape
    t_tile, t_pad = _choose_t_tile(T, B, H, _STREAM_BUDGET)
    enc_bth = jnp.transpose(encoder_outputs, (1, 0, 2)).astype(jnp.float32)
    e_proj = (jnp.einsum("bth,hk->btk", enc_bth, params["w_attn_e"],
                         preferred_element_type=jnp.float32)
              + params["b_attn"][None, :, :])
    if t_pad > T:
        pad = ((0, 0), (0, t_pad - T), (0, 0))
        enc_bth = jnp.pad(enc_bth, pad)
        e_proj = jnp.pad(e_proj, pad)
    return enc_bth.astype(stream_dtype), e_proj.astype(stream_dtype), t_tile


def prepare_output_proj(params, B, H):
    """Pad the fused (2H, V) output weight / bias to a multiple of the V tile.
    Padded bias columns are -1e30 so they never contribute to the logsumexp."""
    w = params["w_out"]                         # (2H, V) bf16
    b = params["b_out"]                         # (1, V)  f32
    V = w.shape[1]
    v_tile = _choose_v_tile(V, H, B, _STREAM_BUDGET)
    v_pad = _round_up(V, v_tile)
    if v_pad > V:
        w = jnp.pad(w, ((0, 0), (0, v_pad - V)))
        b = jnp.concatenate([b, jnp.full((1, v_pad - V), -1e30, b.dtype)], axis=1)
    return w, b, v_tile


def _full_spec(shape):
    zeros = (0,) * len(shape)
    return pl.BlockSpec(shape, lambda j: zeros)


# ---------------------------------------------------------------------------
# One decode step (mirrors Decoder.forward for a single timestep).
# ---------------------------------------------------------------------------
def decoder_step(input_ids, h_last, enc_bth, e_proj, w_out_pad, b_out_pad, params,
                 *, seq_len, t_tile, v_tile, out_size):
    # TODO(synk): fold the embedding gather into kernel A (scalar-prefetch
    # input_ids + pl.Element row gather); the XLA gather only moves B*E floats.
    emb = params["embed"][input_ids]                        # (B, E) f32
    # TODO(synk): nn.Dropout applied as identity (eval-mode semantics).

    B, t_padded, H = enc_bth.shape
    E = emb.shape[1]
    n_t = t_padded // t_tile
    v_padded = w_out_pad.shape[1]
    n_v = v_padded // v_tile

    kern_a = functools.partial(attn_gru_kernel, seq_len=seq_len, t_tile=t_tile)
    scores, h_new, hc = pl.pallas_call(
        kern_a,
        out_shape=(
            jax.ShapeDtypeStruct((B, t_padded), jnp.float32),
            jax.ShapeDtypeStruct((B, H), jnp.float32),
            jax.ShapeDtypeStruct((B, 2 * H), jnp.bfloat16),
        ),
        grid_spec=pltpu.PrefetchScalarGridSpec(
            num_scalar_prefetch=0,
            grid=(n_t,),
            in_specs=[
                _full_spec((B, E)),                                   # emb
                _full_spec((B, H)),                                   # h_prev
                pl.BlockSpec((B, t_tile, H), lambda j: (0, j, 0)),    # enc (streamed)
                pl.BlockSpec((B, t_tile, H), lambda j: (0, j, 0)),    # e_proj (streamed)
                _full_spec((H, H)),                                   # w_attn_h (bf16)
                _full_spec((1, H)),                                   # v_attn
                _full_spec((E, 3 * H)),                               # w_ix (bf16)
                _full_spec((H, 3 * H)),                               # w_ic (bf16)
                _full_spec((H, 3 * H)),                               # w_hh (bf16)
                _full_spec((1, 3 * H)),                               # b_ih
                _full_spec((1, 3 * H)),                               # b_hh
            ],
            out_specs=[
                pl.BlockSpec((B, t_tile), lambda j: (0, j)),
                _full_spec((B, H)),
                _full_spec((B, 2 * H)),
            ],
            scratch_shapes=[
                pltpu.VMEM((B, H), jnp.float32),    # h_proj
                pltpu.VMEM((B, 1), jnp.float32),    # running max
                pltpu.VMEM((B, 1), jnp.float32),    # running sum-exp
                pltpu.VMEM((B, H), jnp.float32),    # context accumulator
            ],
        ),
        compiler_params=pltpu.CompilerParams(
            dimension_semantics=("arbitrary",),
            vmem_limit_bytes=_VMEM_LIMIT),
    )(emb, h_last, enc_bth, e_proj,
      params["w_attn_h"], params["v_attn"],
      params["w_ix"], params["w_ic"], params["w_hh"],
      params["b_ih"], params["b_hh"])
    # TODO(synk): inside an autoregressive scan, alias h_last with h_new via
    # input_output_aliases (requires donating the hidden-state buffer) and fuse
    # kernels A and B into one pallas_call over the V grid with a pl.when(j==0)
    # attention/GRU prologue to drop one launch + the (B,2H) HBM round trip.

    logits, lse = pl.pallas_call(
        out_proj_kernel,
        out_shape=(
            jax.ShapeDtypeStruct((B, v_padded), jnp.float32),
            jax.ShapeDtypeStruct((B, 1), jnp.float32),
        ),
        grid_spec=pltpu.PrefetchScalarGridSpec(
            num_scalar_prefetch=0,
            grid=(n_v,),
            in_specs=[
                _full_spec((B, 2 * H)),                               # [h_new | ctx] bf16
                pl.BlockSpec((2 * H, v_tile), lambda j: (0, j)),      # fused weight slab
                pl.BlockSpec((1, v_tile), lambda j: (0, j)),          # bias slab
            ],
            out_specs=[
                pl.BlockSpec((B, v_tile), lambda j: (0, j)),
                _full_spec((B, 1)),
            ],
            scratch_shapes=[pltpu.VMEM((B, 1), jnp.float32),
                            pltpu.VMEM((B, 1), jnp.float32)],
        ),
        compiler_params=pltpu.CompilerParams(
            dimension_semantics=("arbitrary",),
            vmem_limit_bytes=_VMEM_LIMIT),
    )(hc, w_out_pad, b_out_pad)

    logp = logits[:, :out_size] - lse                       # log-softmax
    attn = jax.nn.softmax(scores[:, :seq_len], axis=1)      # exact (tiny B x T)
    return logp, h_new, attn


def decoder_forward(input_ids, last_hidden, encoder_outputs, params):
    """Mirrors Decoder.forward(input, last_hidden, encoder_outputs)."""
    T, B, H = encoder_outputs.shape
    enc_bth, e_proj, t_tile = prepare_encoder(encoder_outputs, params)
    w_out_pad, b_out_pad, v_tile = prepare_output_proj(params, B, H)
    V = params["b_out"].shape[1]
    logp, h_new, attn = decoder_step(
        input_ids, last_hidden[-1], enc_bth, e_proj, w_out_pad, b_out_pad, params,
        seq_len=T, t_tile=t_tile, v_tile=v_tile, out_size=V)
    return logp, h_new[None, :, :], attn[:, None, :]


# ---------------------------------------------------------------------------
# Parameters (torch-layout f32 reference copies + kernel-format copies).
# ---------------------------------------------------------------------------
def init_params(key, embed_size, hidden_size, output_size, stream_dtype=jnp.bfloat16):
    E, H, V = embed_size, hidden_size, output_size
    keys = jax.random.split(key, 10)

    def u(k, shape, bound):
        return jax.random.uniform(k, shape, jnp.float32, -bound, bound)

    embed = jax.random.normal(keys[0], (V, E), jnp.float32)      # nn.Embedding

    ba = 1.0 / (2 * H) ** 0.5                                    # attn Linear(2H -> H)
    w_attn = u(keys[1], (H, 2 * H), ba)                          # torch (out, in)
    b_attn = u(keys[2], (H,), ba)
    v_attn = u(keys[3], (H,), 1.0 / H ** 0.5)                    # Attention.v

    bg = 1.0 / H ** 0.5                                          # GRU(E+H -> H)
    w_ih = u(keys[4], (3 * H, E + H), bg)                        # gate rows [r; z; n]
    w_hh = u(keys[5], (3 * H, H), bg)
    b_ih = u(keys[6], (3 * H,), bg)
    b_hh = u(keys[7], (3 * H,), bg)

    bo = 1.0 / (2 * H) ** 0.5                                    # out Linear(2H -> V)
    w_out = u(keys[8], (V, 2 * H), bo)
    b_out = u(keys[9], (V,), bo)

    ref = dict(embed=embed, w_attn=w_attn, b_attn=b_attn, v_attn=v_attn,
               w_ih=w_ih, w_hh=w_hh, b_ih=b_ih, b_hh=b_hh,
               w_out=w_out, b_out=b_out)

    params = dict(
        embed=embed,
        # attention Linear input order is [hidden, encoder]:
        w_attn_h=w_attn[:, :H].T.astype(stream_dtype),           # (H, H) bf16
        w_attn_e=w_attn[:, H:].T,                                # (H, H) f32 (host-side)
        b_attn=b_attn[None, :],                                  # (1, H) f32
        v_attn=v_attn[None, :],                                  # (1, H) f32
        # GRU input order is [embedded, context]; gates fused along columns:
        w_ix=w_ih[:, :E].T.astype(stream_dtype),                 # (E, 3H) bf16
        w_ic=w_ih[:, E:].T.astype(stream_dtype),                 # (H, 3H) bf16
        w_hh=w_hh.T.astype(stream_dtype),                        # (H, 3H) bf16
        b_ih=b_ih[None, :],                                      # (1, 3H) f32
        b_hh=b_hh[None, :],                                      # (1, 3H) f32
        # output Linear input order is [h_new, context]; fused (2H, V):
        w_out=w_out.T.astype(stream_dtype),                      # (2H, V) bf16
        b_out=b_out[None, :],                                    # (1, V)  f32
    )
    return params, ref


# ---------------------------------------------------------------------------
# Pure-JAX f32 reference of the PyTorch forward (for a loose correctness check).
# ---------------------------------------------------------------------------
def decoder_reference(input_ids, last_hidden, encoder_outputs, ref):
    emb = ref["embed"][input_ids]                                # (B, E)
    h = last_hidden[-1]                                          # (B, H)
    enc = jnp.transpose(encoder_outputs, (1, 0, 2))              # (B, T, H)
    hrep = jnp.broadcast_to(h[:, None, :], enc.shape)
    cat = jnp.concatenate([hrep, enc], axis=2)                   # (B, T, 2H)
    energy = jax.nn.relu(cat @ ref["w_attn"].T + ref["b_attn"])  # (B, T, H)
    scores = jnp.einsum("bth,h->bt", energy, ref["v_attn"])
    attn = jax.nn.softmax(scores, axis=1)
    ctx = jnp.einsum("bt,bth->bh", attn, enc)
    x = jnp.concatenate([emb, ctx], axis=1)
    gi = x @ ref["w_ih"].T + ref["b_ih"]
    gh = h @ ref["w_hh"].T + ref["b_hh"]
    H = h.shape[1]
    r = jax.nn.sigmoid(gi[:, :H] + gh[:, :H])
    z = jax.nn.sigmoid(gi[:, H:2 * H] + gh[:, H:2 * H])
    n = jnp.tanh(gi[:, 2 * H:] + r * gh[:, 2 * H:])
    h_new = (1.0 - z) * n + z * h
    out = jnp.concatenate([h_new, ctx], axis=1) @ ref["w_out"].T + ref["b_out"]
    logp = jax.nn.log_softmax(out, axis=1)
    return logp, h_new[None, :, :], attn[:, None, :]


if __name__ == "__main__":
    # NOTE: B is tiny here for the smoke test; in production pad/gather decode
    # requests so B >= 8 (sublane width) to raise MXU/VPU utilization.
    B, T = 2, 8
    E, H, V = 32, 32, 64            # embed_size, hidden_size, output_size
    n_layers = 1

    key = jax.random.PRNGKey(0)
    kp, k1, k2, k3 = jax.random.split(key, 4)
    params, ref = init_params(kp, E, H, V)

    input_ids = jax.random.randint(k1, (B,), 0, V)                      # (B,)
    last_hidden = jax.random.normal(k2, (n_layers, B, H), jnp.float32)  # (1, B, H)
    encoder_outputs = jax.random.normal(k3, (T, B, H), jnp.float32)     # (T, B, H)

    out = decoder_forward(input_ids, last_hidden, encoder_outputs, params)
    logp, hidden, attn_w = jax.block_until_ready(out)

    assert logp.shape == (B, V)
    assert hidden.shape == (n_layers, B, H)
    assert attn_w.shape == (B, 1, T)
    # Exact normalizations (no approx reciprocal anywhere on the softmax path).
    assert jnp.allclose(jnp.exp(logp).sum(axis=1), 1.0, atol=1e-4)
    assert jnp.allclose(attn_w.sum(axis=2), 1.0, atol=1e-4)

    # Loose check against a pure-JAX f32 reference of the PyTorch forward
    # (kernel streams weights/activations in bf16, hence the tolerances).
    logp_r, hidden_r, attn_r = decoder_reference(
        input_ids, last_hidden, encoder_outputs, ref)
    assert jnp.allclose(attn_w, attn_r, atol=0.08)
    assert jnp.allclose(hidden, hidden_r, atol=0.08)
    assert jnp.allclose(logp, logp_r, atol=0.2)

    print("KERNEL_OK")
</pallas_src>

<mosaic_0001>
module attributes {stable_mosaic.version = 11 : i64} {
  func.func @attn_gru_kernel(%arg0: i32, %arg1: memref<2x32xf32, #tpu.memory_space<vmem>>, %arg2: memref<2x32xf32, #tpu.memory_space<vmem>>, %arg3: memref<2x8x32xbf16, #tpu.memory_space<vmem>>, %arg4: memref<2x8x32xbf16, #tpu.memory_space<vmem>>, %arg5: memref<32x32xbf16, #tpu.memory_space<vmem>>, %arg6: memref<1x32xf32, #tpu.memory_space<vmem>>, %arg7: memref<32x96xbf16, #tpu.memory_space<vmem>>, %arg8: memref<32x96xbf16, #tpu.memory_space<vmem>>, %arg9: memref<32x96xbf16, #tpu.memory_space<vmem>>, %arg10: memref<1x96xf32, #tpu.memory_space<vmem>>, %arg11: memref<1x96xf32, #tpu.memory_space<vmem>>, %arg12: memref<2x8xf32, #tpu.memory_space<vmem>>, %arg13: memref<2x32xf32, #tpu.memory_space<vmem>>, %arg14: memref<2x64xbf16, #tpu.memory_space<vmem>>, %arg15: memref<2x32xf32, #tpu.memory_space<vmem>>, %arg16: memref<2x1xf32, #tpu.memory_space<vmem>>, %arg17: memref<2x1xf32, #tpu.memory_space<vmem>>, %arg18: memref<2x32xf32, #tpu.memory_space<vmem>>) attributes {dimension_semantics = [#tpu.dimension_semantics<arbitrary>], iteration_bounds = array<i64: 1>, scalar_prefetch = 0 : i64, scratch_operands = 4 : i64, tpu.core_type = #tpu.core_type<tc>, window_params = [{pipeline_mode = #tpu.pipeline_mode<synchronous>, transform_indices = @transform_0, window_bounds = array<i64: 2, 32>}, {pipeline_mode = #tpu.pipeline_mode<synchronous>, transform_indices = @transform_1, window_bounds = array<i64: 2, 32>}, {transform_indices = @transform_2, window_bounds = array<i64: 2, 8, 32>}, {transform_indices = @transform_3, window_bounds = array<i64: 2, 8, 32>}, {pipeline_mode = #tpu.pipeline_mode<synchronous>, transform_indices = @transform_4, window_bounds = array<i64: 32, 32>}, {pipeline_mode = #tpu.pipeline_mode<synchronous>, transform_indices = @transform_5, window_bounds = array<i64: 1, 32>}, {pipeline_mode = #tpu.pipeline_mode<synchronous>, transform_indices = @transform_6, window_bounds = array<i64: 32, 96>}, {pipeline_mode = #tpu.pipeline_mode<synchronous>, transform_indices = @transform_7, window_bounds = array<i64: 32, 96>}, {pipeline_mode = #tpu.pipeline_mode<synchronous>, transform_indices = @transform_8, window_bounds = array<i64: 32, 96>}, {pipeline_mode = #tpu.pipeline_mode<synchronous>, transform_indices = @transform_9, window_bounds = array<i64: 1, 96>}, {pipeline_mode = #tpu.pipeline_mode<synchronous>, transform_indices = @transform_10, window_bounds = array<i64: 1, 96>}, {transform_indices = @transform_11, window_bounds = array<i64: 2, 8>}, {pipeline_mode = #tpu.pipeline_mode<synchronous>, transform_indices = @transform_12, window_bounds = array<i64: 2, 32>}, {pipeline_mode = #tpu.pipeline_mode<synchronous>, transform_indices = @transform_13, window_bounds = array<i64: 2, 64>}]} {
    %c0 = arith.constant 0 : index
    %c0_0 = arith.constant 0 : index
    %0 = vector.load %arg2[%c0, %c0_0] : memref<2x32xf32, #tpu.memory_space<vmem>>, vector<2x32xf32>
    %c0_i32 = arith.constant 0 : i32
    %1 = arith.cmpi eq, %arg0, %c0_i32 : i32
    %2 = arith.extui %1 : i1 to i32
    %c0_i32_1 = arith.constant 0 : i32
    %3 = arith.cmpi ne, %2, %c0_i32_1 : i32
    scf.if %3 {
      %cst_34 = arith.constant 0xFF800000 : f32
      %55 = vector.broadcast %cst_34 : f32 to vector<2x1xf32>
      %c0_35 = arith.constant 0 : index
      %c0_36 = arith.constant 0 : index
      %56 = vector.load %arg16[%c0_35, %c0_36] : memref<2x1xf32, #tpu.memory_space<vmem>>, vector<2x1xf32>
      tpu.vector_store %arg16[%c0_35, %c0_36], %55 {strides = array<i32>} : memref<2x1xf32, #tpu.memory_space<vmem>>, vector<2x1xf32>,
      %cst_37 = arith.constant 0.000000e+00 : f32
      %57 = vector.broadcast %cst_37 : f32 to vector<2x1xf32>
      %c0_38 = arith.constant 0 : index
      %c0_39 = arith.constant 0 : index
      %58 = vector.load %arg17[%c0_38, %c0_39] : memref<2x1xf32, #tpu.memory_space<vmem>>, vector<2x1xf32>
      tpu.vector_store %arg17[%c0_38, %c0_39], %57 {strides = array<i32>} : memref<2x1xf32, #tpu.memory_space<vmem>>, vector<2x1xf32>,
      %cst_40 = arith.constant 0.000000e+00 : f32
      %59 = vector.broadcast %cst_40 : f32 to vector<2x32xf32>
      %c0_41 = arith.constant 0 : index
      %c0_42 = arith.constant 0 : index
      %60 = vector.load %arg18[%c0_41, %c0_42] : memref<2x32xf32, #tpu.memory_space<vmem>>, vector<2x32xf32>
      tpu.vector_store %arg18[%c0_41, %c0_42], %59 {strides = array<i32>} : memref<2x32xf32, #tpu.memory_space<vmem>>, vector<2x32xf32>,
      %61 = arith.truncf %0 : vector<2x32xf32> to vector<2x32xbf16>
      %c0_43 = arith.constant 0 : index
      %c0_44 = arith.constant 0 : index
      %62 = vector.load %arg5[%c0_43, %c0_44] : memref<32x32xbf16, #tpu.memory_space<vmem>>, vector<32x32xbf16>
      %cst_45 = arith.constant dense<0.000000e+00> : vector<2x32xf32>
      %63 = tpu.matmul %61, %62, %cst_45 {dimension_numbers = #tpu.dot_dimension_numbers<[1], [0], [0], [1], [0, 0, 1, 1], [], []>} : vector<2x32xbf16>, vector<32x32xbf16>, vector<2x32xf32> -> vector<2x32xf32>
      %c0_46 = arith.constant 0 : index
      %c0_47 = arith.constant 0 : index
      %64 = vector.load %arg15[%c0_46, %c0_47] : memref<2x32xf32, #tpu.memory_space<vmem>>, vector<2x32xf32>
      tpu.vector_store %arg15[%c0_46, %c0_47], %63 {strides = array<i32>} : memref<2x32xf32, #tpu.memory_space<vmem>>, vector<2x32xf32>,
    } else {
    }
    %c0_2 = arith.constant 0 : index
    %c0_3 = arith.constant 0 : index
    %c0_4 = arith.constant 0 : index
    %4 = vector.load %arg3[%c0_2, %c0_3, %c0_4] : memref<2x8x32xbf16, #tpu.memory_space<vmem>>, vector<2x8x32xbf16>
    %c0_5 = arith.constant 0 : index
    %c0_6 = arith.constant 0 : index
    %c0_7 = arith.constant 0 : index
    %5 = vector.load %arg4[%c0_5, %c0_6, %c0_7] : memref<2x8x32xbf16, #tpu.memory_space<vmem>>, vector<2x8x32xbf16>
    %6 = arith.extf %5 : vector<2x8x32xbf16> to vector<2x8x32xf32>
    %c0_8 = arith.constant 0 : index
    %c0_9 = arith.constant 0 : index
    %7 = vector.load %arg15[%c0_8, %c0_9] : memref<2x32xf32, #tpu.memory_space<vmem>>, vector<2x32xf32>
    %8 = vector.shape_cast %7 : vector<2x32xf32> to vector<2x1x32xf32>
    %9 = vector.broadcast %8 : vector<2x1x32xf32> to vector<2x8x32xf32>
    %10 = arith.addf %9, %6 : vector<2x8x32xf32>
    %cst = arith.constant 0.000000e+00 : f32
    %11 = vector.broadcast %cst : f32 to vector<2x8x32xf32>
    %12 = arith.maximumf %10, %11 : vector<2x8x32xf32>
    %c0_10 = arith.constant 0 : index
    %c0_11 = arith.constant 0 : index
    %13 = vector.load %arg6[%c0_10, %c0_11] : memref<1x32xf32, #tpu.memory_space<vmem>>, vector<1x32xf32>
    %14 = vector.shape_cast %13 : vector<1x32xf32> to vector<1x1x32xf32>
    %15 = vector.broadcast %14 : vector<1x1x32xf32> to vector<2x8x32xf32>
    %16 = arith.mulf %12, %15 : vector<2x8x32xf32>
    %cst_12 = arith.constant dense<0.000000e+00> : vector<2x8xf32>
    %17 = vector.multi_reduction <add>, %16, %cst_12 [2] : vector<2x8x32xf32> to vector<2x8xf32>
    %c8_i32 = arith.constant 8 : i32
    %18 = arith.muli %arg0, %c8_i32 : i32
    %19 = tpu.iota {dimensions = array<i32: 1>} : vector<2x8xi32>
    %20 = vector.broadcast %18 : i32 to vector<2x8xi32>
    %21 = arith.addi %20, %19 : vector<2x8xi32>
    %c8_i32_13 = arith.constant 8 : i32
    %22 = vector.broadcast %c8_i32_13 : i32 to vector<2x8xi32>
    %23 = arith.cmpi slt, %21, %22 : vector<2x8xi32>
    %cst_14 = arith.constant -1.000000e+30 : f32
    %24 = vector.broadcast %cst_14 : f32 to vector<2x8xf32>
    %25 = arith.select %23, %17, %24 : vector<2x8xi1>, vector<2x8xf32>
    %c0_15 = arith.constant 0 : index
    %c0_16 = arith.constant 0 : index
    %26 = vector.load %arg12[%c0_15, %c0_16] : memref<2x8xf32, #tpu.memory_space<vmem>>, vector<2x8xf32>
    tpu.vector_store %arg12[%c0_15, %c0_16], %25 {strides = array<i32>} : memref<2x8xf32, #tpu.memory_space<vmem>>, vector<2x8xf32>,
    %c0_17 = arith.constant 0 : index
    %c0_18 = arith.constant 0 : index
    %27 = vector.load %arg16[%c0_17, %c0_18] : memref<2x1xf32, #tpu.memory_space<vmem>>, vector<2x1xf32>
    %cst_19 = arith.constant dense<0xFF800000> : vector<2xf32>
    %28 = vector.multi_reduction <maximumf>, %25, %cst_19 [1] : vector<2x8xf32> to vector<2xf32>
    %29 = vector.shape_cast %28 : vector<2xf32> to vector<2x1xf32>
    %30 = arith.maximumf %27, %29 : vector<2x1xf32>
    %31 = arith.subf %27, %30 : vector<2x1xf32>
    %32 = math.exp %31 : vector<2x1xf32>
    %33 = vector.broadcast %30 : vector<2x1xf32> to vector<2x8xf32>
    %34 = arith.subf %25, %33 : vector<2x8xf32>
    %35 = math.exp %34 : vector<2x8xf32>
    %c0_20 = arith.constant 0 : index
    %c0_21 = arith.constant 0 : index
    %36 = vector.load %arg17[%c0_20, %c0_21] : memref<2x1xf32, #tpu.memory_space<vmem>>, vector<2x1xf32>
    %37 = arith.mulf %32, %36 : vector<2x1xf32>
    %cst_22 = arith.constant dense<0.000000e+00> : vector<2xf32>
    %38 = vector.multi_reduction <add>, %35, %cst_22 [1] : vector<2x8xf32> to vector<2xf32>
    %39 = vector.shape_cast %38 : vector<2xf32> to vector<2x1xf32>
    %40 = arith.addf %37, %39 : vector<2x1xf32>
    %c0_23 = arith.constant 0 : index
    %c0_24 = arith.constant 0 : index
    %41 = vector.load %arg17[%c0_23, %c0_24] : memref<2x1xf32, #tpu.memory_space<vmem>>, vector<2x1xf32>
    tpu.vector_store %arg17[%c0_23, %c0_24], %40 {strides = array<i32>} : memref<2x1xf32, #tpu.memory_space<vmem>>, vector<2x1xf32>,
    %42 = vector.shape_cast %35 : vector<2x8xf32> to vector<2x1x8xf32>
    %43 = arith.truncf %42 : vector<2x1x8xf32> to vector<2x1x8xbf16>
    "tpu.trace_start"() <{level = 10 : i32, message = "bqt,bth->bqh"}> : () -> ()
    %cst_25 = arith.constant dense<0.000000e+00> : vector<2x1x32xf32>
    %44 = tpu.matmul %43, %4, %cst_25 {dimension_numbers = #tpu.dot_dimension_numbers<[2], [1], [1], [2], [0, 0, 0, 1, 1, 2], [0], [0]>} : vector<2x1x8xbf16>, vector<2x8x32xbf16>, vector<2x1x32xf32> -> vector<2x1x32xf32>
    "tpu.trace_stop"() : () -> ()
    %45 = vector.shape_cast %44 : vector<2x1x32xf32> to vector<2x32xf32>
    %c0_26 = arith.constant 0 : index
    %c0_27 = arith.constant 0 : index
    %46 = vector.load %arg18[%c0_26, %c0_27] : memref<2x32xf32, #tpu.memory_space<vmem>>, vector<2x32xf32>
    %47 = vector.broadcast %32 : vector<2x1xf32> to vector<2x32xf32>
    %48 = arith.mulf %47, %46 : vector<2x32xf32>
    %49 = arith.addf %48, %45 : vector<2x32xf32>
    %c0_28 = arith.constant 0 : index
    %c0_29 = arith.constant 0 : index
    %50 = vector.load %arg18[%c0_28, %c0_29] : memref<2x32xf32, #tpu.memory_space<vmem>>, vector<2x32xf32>
    tpu.vector_store %arg18[%c0_28, %c0_29], %49 {strides = array<i32>} : memref<2x32xf32, #tpu.memory_space<vmem>>, vector<2x32xf32>,
    %c0_30 = arith.constant 0 : index
    %c0_31 = arith.constant 0 : index
    %51 = vector.load %arg16[%c0_30, %c0_31] : memref<2x1xf32, #tpu.memory_space<vmem>>, vector<2x1xf32>
    tpu.vector_store %arg16[%c0_30, %c0_31], %30 {strides = array<i32>} : memref<2x1xf32, #tpu.memory_space<vmem>>, vector<2x1xf32>,
    %c0_i32_32 = arith.constant 0 : i32
    %52 = arith.cmpi eq, %arg0, %c0_i32_32 : i32
    %53 = arith.extui %52 : i1 to i32
    %c0_i32_33 = arith.constant 0 : i32
    %54 = arith.cmpi ne, %53, %c0_i32_33 : i32
    scf.if %54 {
      %c0_34 = arith.constant 0 : index
      %c0_35 = arith.constant 0 : index
      %55 = vector.load %arg18[%c0_34, %c0_35] : memref<2x32xf32, #tpu.memory_space<vmem>>, vector<2x32xf32>
      %c0_36 = arith.constant 0 : index
      %c0_37 = arith.constant 0 : index
      %56 = vector.load %arg17[%c0_36, %c0_37] : memref<2x1xf32, #tpu.memory_space<vmem>>, vector<2x1xf32>
      %57 = vector.broadcast %56 : vector<2x1xf32> to vector<2x32xf32>
      %58 = arith.divf %55, %57 : vector<2x32xf32>
      %c0_38 = arith.constant 0 : index
      %c0_39 = arith.constant 0 : index
      %59 = vector.load %arg1[%c0_38, %c0_39] : memref<2x32xf32, #tpu.memory_space<vmem>>, vector<2x32xf32>
      %60 = arith.truncf %59 : vector<2x32xf32> to vector<2x32xbf16>
      %c0_40 = arith.constant 0 : index
      %c0_41 = arith.constant 0 : index
      %61 = vector.load %arg7[%c0_40, %c0_41] : memref<32x96xbf16, #tpu.memory_space<vmem>>, vector<32x96xbf16>
      %cst_42 = arith.constant dense<0.000000e+00> : vector<2x96xf32>
      %62 = tpu.matmul %60, %61, %cst_42 {dimension_numbers = #tpu.dot_dimension_numbers<[1], [0], [0], [1], [0, 0, 1, 1], [], []>} : vector<2x32xbf16>, vector<32x96xbf16>, vector<2x96xf32> -> vector<2x96xf32>
      %63 = arith.truncf %58 : vector<2x32xf32> to vector<2x32xbf16>
      %c0_43 = arith.constant 0 : index
      %c0_44 = arith.constant 0 : index
      %64 = vector.load %arg8[%c0_43, %c0_44] : memref<32x96xbf16, #tpu.memory_space<vmem>>, vector<32x96xbf16>
      %cst_45 = arith.constant dense<0.000000e+00> : vector<2x96xf32>
      %65 = tpu.matmul %63, %64, %cst_45 {dimension_numbers = #tpu.dot_dimension_numbers<[1], [0], [0], [1], [0, 0, 1, 1], [], []>} : vector<2x32xbf16>, vector<32x96xbf16>, vector<2x96xf32> -> vector<2x96xf32>
      %66 = arith.addf %62, %65 : vector<2x96xf32>
      %c0_46 = arith.constant 0 : index
      %c0_47 = arith.constant 0 : index
      %67 = vector.load %arg10[%c0_46, %c0_47] : memref<1x96xf32, #tpu.memory_space<vmem>>, vector<1x96xf32>
      %68 = vector.broadcast %67 : vector<1x96xf32> to vector<2x96xf32>
      %69 = arith.addf %66, %68 : vector<2x96xf32>
      %70 = arith.truncf %0 : vector<2x32xf32> to vector<2x32xbf16>
      %c0_48 = arith.constant 0 : index
      %c0_49 = arith.constant 0 : index
      %71 = vector.load %arg9[%c0_48, %c0_49] : memref<32x96xbf16, #tpu.memory_space<vmem>>, vector<32x96xbf16>
      %cst_50 = arith.constant dense<0.000000e+00> : vector<2x96xf32>
      %72 = tpu.matmul %70, %71, %cst_50 {dimension_numbers = #tpu.dot_dimension_numbers<[1], [0], [0], [1], [0, 0, 1, 1], [], []>} : vector<2x32xbf16>, vector<32x96xbf16>, vector<2x96xf32> -> vector<2x96xf32>
      %c0_51 = arith.constant 0 : index
      %c0_52 = arith.constant 0 : index
      %73 = vector.load %arg11[%c0_51, %c0_52] : memref<1x96xf32, #tpu.memory_space<vmem>>, vector<1x96xf32>
      %74 = vector.broadcast %73 : vector<1x96xf32> to vector<2x96xf32>
      %75 = arith.addf %72, %74 : vector<2x96xf32>
      %76 = vector.extract_strided_slice %69 {offsets = [0, 0], sizes = [2, 32], strides = [1, 1]} : vector<2x96xf32> to vector<2x32xf32>
      %77 = vector.extract_strided_slice %75 {offsets = [0, 0], sizes = [2, 32], strides = [1, 1]} : vector<2x96xf32> to vector<2x32xf32>
      %78 = arith.addf %76, %77 : vector<2x32xf32>
      %79 = arith.negf %78 : vector<2x32xf32>
      %80 = math.exp %79 : vector<2x32xf32>
      %cst_53 = arith.constant 1.000000e+00 : f32
      %81 = vector.broadcast %cst_53 : f32 to vector<2x32xf32>
      %82 = arith.addf %81, %80 : vector<2x32xf32>
      %83 = arith.divf %81, %82 : vector<2x32xf32>
      %84 = vector.extract_strided_slice %69 {offsets = [0, 32], sizes = [2, 32], strides = [1, 1]} : vector<2x96xf32> to vector<2x32xf32>
      %85 = vector.extract_strided_slice %75 {offsets = [0, 32], sizes = [2, 32], strides = [1, 1]} : vector<2x96xf32> to vector<2x32xf32>
      %86 = arith.addf %84, %85 : vector<2x32xf32>
      %87 = arith.negf %86 : vector<2x32xf32>
      %88 = math.exp %87 : vector<2x32xf32>
      %cst_54 = arith.constant 1.000000e+00 : f32
      %89 = vector.broadcast %cst_54 : f32 to vector<2x32xf32>
      %90 = arith.addf %89, %88 : vector<2x32xf32>
      %91 = arith.divf %89, %90 : vector<2x32xf32>
      %92 = vector.extract_strided_slice %69 {offsets = [0, 64], sizes = [2, 32], strides = [1, 1]} : vector<2x96xf32> to vector<2x32xf32>
      %93 = vector.extract_strided_slice %75 {offsets = [0, 64], sizes = [2, 32], strides = [1, 1]} : vector<2x96xf32> to vector<2x32xf32>
      %94 = arith.mulf %83, %93 : vector<2x32xf32>
      %95 = arith.addf %92, %94 : vector<2x32xf32>
      %96 = math.tanh %95 : vector<2x32xf32>
      %cst_55 = arith.constant 1.000000e+00 : f32
      %97 = vector.broadcast %cst_55 : f32 to vector<2x32xf32>
      %98 = arith.subf %97, %91 : vector<2x32xf32>
      %99 = arith.mulf %98, %96 : vector<2x32xf32>
      %100 = arith.mulf %91, %0 : vector<2x32xf32>
      %101 = arith.addf %99, %100 : vector<2x32xf32>
      %c0_56 = arith.constant 0 : index
      %c0_57 = arith.constant 0 : index
      %102 = vector.load %arg13[%c0_56, %c0_57] : memref<2x32xf32, #tpu.memory_space<vmem>>, vector<2x32xf32>
      tpu.vector_store %arg13[%c0_56, %c0_57], %101 {strides = array<i32>} : memref<2x32xf32, #tpu.memory_space<vmem>>, vector<2x32xf32>,
      %103 = arith.truncf %101 : vector<2x32xf32> to vector<2x32xbf16>
      %c0_58 = arith.constant 0 : index
      %c0_59 = arith.constant 0 : index
      %104 = vector.load %arg14[%c0_58, %c0_59] : memref<2x64xbf16, #tpu.memory_space<vmem>>, vector<2x32xbf16>
      tpu.vector_store %arg14[%c0_58, %c0_59], %103 {strides = array<i32>} : memref<2x64xbf16, #tpu.memory_space<vmem>>, vector<2x32xbf16>,
      %105 = arith.truncf %58 : vector<2x32xf32> to vector<2x32xbf16>
      %c0_60 = arith.constant 0 : index
      %c32 = arith.constant 32 : index
      %106 = vector.load %arg14[%c0_60, %c32] : memref<2x64xbf16, #tpu.memory_space<vmem>>, vector<2x32xbf16>
      tpu.vector_store %arg14[%c0_60, %c32], %105 {strides = array<i32>} : memref<2x64xbf16, #tpu.memory_space<vmem>>, vector<2x32xbf16>,
    } else {
    }
    return
  }
  func.func @transform_0(%arg0: i32) -> (i32, i32) {
    %c0_i32 = arith.constant 0 : i32
    %c0_i32_0 = arith.constant 0 : i32
    %c0_i32_1 = arith.constant 0 : i32
    return %c0_i32, %c0_i32_0 : i32, i32
  }
  func.func @transform_1(%arg0: i32) -> (i32, i32) {
    %c0_i32 = arith.constant 0 : i32
    %c0_i32_0 = arith.constant 0 : i32
    %c0_i32_1 = arith.constant 0 : i32
    return %c0_i32, %c0_i32_0 : i32, i32
  }
  func.func @transform_2(%arg0: i32) -> (i32, i32, i32) {
    %c0_i32 = arith.constant 0 : i32
    %c0_i32_0 = arith.constant 0 : i32
    %c0_i32_1 = arith.constant 0 : i32
    return %c0_i32, %arg0, %c0_i32_0 : i32, i32, i32
  }
  func.func @transform_3(%arg0: i32) -> (i32, i32, i32) {
    %c0_i32 = arith.constant 0 : i32
    %c0_i32_0 = arith.constant 0 : i32
    %c0_i32_1 = arith.constant 0 : i32
    return %c0_i32, %arg0, %c0_i32_0 : i32, i32, i32
  }
  func.func @transform_4(%arg0: i32) -> (i32, i32) {
    %c0_i32 = arith.constant 0 : i32
    %c0_i32_0 = arith.constant 0 : i32
    %c0_i32_1 = arith.constant 0 : i32
    return %c0_i32, %c0_i32_0 : i32, i32
  }
  func.func @transform_5(%arg0: i32) -> (i32, i32) {
    %c0_i32 = arith.constant 0 : i32
    %c0_i32_0 = arith.constant 0 : i32
    %c0_i32_1 = arith.constant 0 : i32
    return %c0_i32, %c0_i32_0 : i32, i32
  }
  func.func @transform_6(%arg0: i32) -> (i32, i32) {
    %c0_i32 = arith.constant 0 : i32
    %c0_i32_0 = arith.constant 0 : i32
    %c0_i32_1 = arith.constant 0 : i32
    return %c0_i32, %c0_i32_0 : i32, i32
  }
  func.func @transform_7(%arg0: i32) -> (i32, i32) {
    %c0_i32 = arith.constant 0 : i32
    %c0_i32_0 = arith.constant 0 : i32
    %c0_i32_1 = arith.constant 0 : i32
    return %c0_i32, %c0_i32_0 : i32, i32
  }
  func.func @transform_8(%arg0: i32) -> (i32, i32) {
    %c0_i32 = arith.constant 0 : i32
    %c0_i32_0 = arith.constant 0 : i32
    %c0_i32_1 = arith.constant 0 : i32
    return %c0_i32, %c0_i32_0 : i32, i32
  }
  func.func @transform_9(%arg0: i32) -> (i32, i32) {
    %c0_i32 = arith.constant 0 : i32
    %c0_i32_0 = arith.constant 0 : i32
    %c0_i32_1 = arith.constant 0 : i32
    return %c0_i32, %c0_i32_0 : i32, i32
  }
  func.func @transform_10(%arg0: i32) -> (i32, i32) {
    %c0_i32 = arith.constant 0 : i32
    %c0_i32_0 = arith.constant 0 : i32
    %c0_i32_1 = arith.constant 0 : i32
    return %c0_i32, %c0_i32_0 : i32, i32
  }
  func.func @transform_11(%arg0: i32) -> (i32, i32) {
    %c0_i32 = arith.constant 0 : i32
    %c0_i32_0 = arith.constant 0 : i32
    return %c0_i32, %arg0 : i32, i32
  }
  func.func @transform_12(%arg0: i32) -> (i32, i32) {
    %c0_i32 = arith.constant 0 : i32
    %c0_i32_0 = arith.constant 0 : i32
    %c0_i32_1 = arith.constant 0 : i32
    return %c0_i32, %c0_i32_0 : i32, i32
  }
  func.func @transform_13(%arg0: i32) -> (i32, i32) {
    %c0_i32 = arith.constant 0 : i32
    %c0_i32_0 = arith.constant 0 : i32
    %c0_i32_1 = arith.constant 0 : i32
    return %c0_i32, %c0_i32_0 : i32, i32
  }
}

</mosaic_0001>

<bundles_post_ra>
// kernel: tpu_custom_call.1
= control target key start
LH: loop header
LB: loop body
LE: loop exit
PB: predicated region body
PF: predicated region fallthrough
CT: control target
= control target key end

     0   :  { %19 = vsyncpa [#allocation7], 0  ;;  %s1374_s0 = inlined_call_operand.hbm [shape: f32[2,32], index: 0, kind: input, shape index: {}]   ;;  %s1375_s1 = inlined_call_operand.hbm [shape: f32[2,32], index: 1, kind: input, shape index: {}]   ;;  %s1376_s2 = inlined_call_operand.hbm [shape: bf16[2,8,32], index: 2, kind: input, shape index: {}]   ;;  %s1377_s3 = inlined_call_operand.hbm [shape: bf16[2,8,32], index: 3, kind: input, shape index: {}]   ;;  %s1378_s4 = inlined_call_operand.hbm [shape: bf16[32,32], index: 4, kind: input, shape index: {}]   ;;  %s1379_s5 = inlined_call_operand.vmem [shape: f32[1,32], index: 5, kind: input, shape index: {}]   ;;  %s1380_s6 = inlined_call_operand.hbm [shape: bf16[32,96], index: 6, kind: input, shape index: {}]   ;;  %s1381_s7 = inlined_call_operand.hbm [shape: bf16[32,96], index: 7, kind: input, shape index: {}]   ;;  %s1382_s8 = inlined_call_operand.hbm [shape: bf16[32,96], index: 8, kind: input, shape index: {}]   ;;  %s1383_s9 = inlined_call_operand.vmem [shape: f32[1,96], index: 9, kind: input, shape index: {}]   ;;  %s1384_s10 = inlined_call_operand.vmem [shape: f32[1,96], index: 10, kind: input, shape index: {}]   ;;  %s1385_s11 = inlined_call_operand.hbm [shape: f32[2,8], index: 11, kind: output, shape index: {0}]   ;;  %s1386_s12 = inlined_call_operand.hbm [shape: f32[2,32], index: 12, kind: output, shape index: {1}]   ;;  %s1387_s13 = inlined_call_operand.hbm [shape: bf16[2,64], index: 13, kind: output, shape index: {2}]  }
   0x1   :  { %20 = vsyncpa [#allocation10], 0 }
   0x2   :  { %21 = vsyncpa [#allocation13], 0 }
   0x3   :  { %22 = vsyncpa [#allocation16], 0 }
   0x4   :  { %23 = vsyncpa [#allocation19], 0 }
   0x5   :  { %24 = vsyncpa [#allocation8], 0 }
   0x6   :  { %25 = vsyncpa [#allocation22], 0  ;;  %s1153_s25 = smov [#allocation9]  }
   0x7   :  { %s42_s26 = sshll.u32 %s1153_s25, 4  ;;  %s43_s26 = int_to_ptr.vmem [resolvable:$true] %s42_s26 }
   0x8   :  { %s927_s27 = scalar_lea.vmem %s43_s26, 32  ;;  %p932_p1 = scmp.lt.s32.totalorder %s43_s26, %s43_s26 }
   0x9   :  { %p928_p0 = scmp.ne.s32.totalorder %s43_s26, %s927_s27  ;;  %p933_p2 = scmp.lt.s32.totalorder %s927_s27, %s927_s27 }
   0xb   :  { %p934_p3 = por %p933_p2, %p932_p1 }
   0xd   :  { %p935_p4 = pnand %p934_p3, %p928_p0 }
   0xf   :  { %938 = shalt.err (!%p935_p4)
}
  0x10   :  { %45 = dma.hbm_to_vmem [thread:$0]  %s1375_s1, 32, %s43_s26, [#allocation10]  }
  0x11   :  { %s1154_s30 = smov [#allocation12]   ;;  %s1155_s15 = smov [#allocation15]  }
  0x12   :  { %s63_s14 = sshll.u32 %s1154_s30, 4  ;;  %s89_s16 = sshll.u32 %s1155_s15, 4  ;;  %s64_s14 = int_to_ptr.vmem [resolvable:$true] %s63_s14  ;;  %s90_s16 = int_to_ptr.vmem [resolvable:$true] %s89_s16 }
  0x13   :  { %s947_s17 = scalar_lea.vmem %s64_s14, 128  ;;  %p952_p6 = scmp.lt.s32.totalorder %s64_s14, %s64_s14 }
  0x14   :  { %p948_p5 = scmp.ne.s32.totalorder %s64_s14, %s947_s17  ;;  %p953_p7 = scmp.lt.s32.totalorder %s947_s17, %s947_s17 }
  0x16   :  { %p954_p8 = por %p953_p7, %p952_p6 }
  0x18   :  { %p955_p9 = pnand %p954_p8, %p948_p5 }
  0x1a   :  { %958 = shalt.err (!%p955_p9)
}
  0x1b   :  { %s1156_s18 = smov 64   ;;  %s1157_s19 = smov 4  }
  0x1c   :  { %69 = dma.hbm_to_vmem [thread:$0]  %s1377_s3, 128, %s64_s14, [#allocation13], %s1156_s18, %s1156_s18, %s1157_s19  }
  0x1d   :  { %s967_s1 = scalar_lea.vmem %s90_s16, 256  ;;  %p972_p11 = scmp.lt.s32.totalorder %s90_s16, %s90_s16 }
  0x1e   :  { %p968_p10 = scmp.ne.s32.totalorder %s90_s16, %s967_s1  ;;  %p973_p12 = scmp.lt.s32.totalorder %s967_s1, %s967_s1 }
  0x20   :  { %p974_p13 = por %p973_p12, %p972_p11 }
  0x22   :  { %p975_p0 = pnand %p974_p13, %p968_p10 }
  0x24   :  { %978 = shalt.err (!%p975_p0)
}
  0x25   :  { %95 = dma.hbm_to_vmem [thread:$0]  %s1380_s6, 256, %s90_s16, [#allocation16], %s1156_s18, %s1156_s18, %s1157_s19  }
  0x26   :  { %s1158_s24 = smov [#allocation6]   ;;  %s1159_s26 = smov [#allocation11]  }
  0x27   :  { %s32_s25 = sshll.u32 %s1158_s24, 4  ;;  %s51_s3 = sshll.u32 %s1159_s26, 4  ;;  %s33_s25 = int_to_ptr.vmem [resolvable:$true] %s32_s25  ;;  %s52_s3 = int_to_ptr.vmem [resolvable:$true] %s51_s3 }
  0x28   :  { %s987_s27 = scalar_lea.vmem %s33_s25, 32  ;;  %p992_p2 = scmp.lt.s32.totalorder %s33_s25, %s33_s25 }
  0x29   :  { %p988_p1 = scmp.ne.s32.totalorder %s33_s25, %s987_s27  ;;  %p993_p3 = scmp.lt.s32.totalorder %s987_s27, %s987_s27 }
  0x2b   :  { %p994_p4 = por %p993_p3, %p992_p2 }
  0x2d   :  { %p995_p5 = pnand %p994_p4, %p988_p1 }
  0x2f   :  { %998 = shalt.err (!%p995_p5)
}
  0x30   :  { %35 = dma.hbm_to_vmem [thread:$0]  %s1374_s0, 32, %s33_s25, [#allocation7]  }
  0x31   :  { %s1007_s30 = scalar_lea.vmem %s52_s3, 128  ;;  %p1012_p7 = scmp.lt.s32.totalorder %s52_s3, %s52_s3 }
  0x32   :  { %p1008_p6 = scmp.ne.s32.totalorder %s52_s3, %s1007_s30  ;;  %p1013_p8 = scmp.lt.s32.totalorder %s1007_s30, %s1007_s30 }
  0x34   :  { %p1014_p9 = por %p1013_p8, %p1012_p7 }
  0x36   :  { %p1015_p10 = pnand %p1014_p9, %p1008_p6 }
  0x38   :  { %1018 = shalt.err (!%p1015_p10)
}
  0x39   :  { %57 = dma.hbm_to_vmem [thread:$0]  %s1376_s2, 128, %s52_s3, [#allocation10], %s1156_s18, %s1156_s18, %s1157_s19  }
  0x3a   :  { %s1160_s15 = smov [#allocation14]   ;;  %s1161_s17 = smov [#allocation17]  }
  0x3b   :  { %s75_s16 = sshll.u32 %s1160_s15, 4  ;;  %s101_s0 = sshll.u32 %s1161_s17, 4  ;;  %s76_s16 = int_to_ptr.vmem [resolvable:$true] %s75_s16  ;;  %s102_s0 = int_to_ptr.vmem [resolvable:$true] %s101_s0 }
  0x3c   :  { %s1027_s20 = scalar_lea.vmem %s76_s16, 256  ;;  %p1032_p12 = scmp.lt.s32.totalorder %s76_s16, %s76_s16 }
  0x3d   :  { %p1028_p11 = scmp.ne.s32.totalorder %s76_s16, %s1027_s20  ;;  %p1033_p13 = scmp.lt.s32.totalorder %s1027_s20, %s1027_s20 }
  0x3f   :  { %p1034_p0 = por %p1033_p13, %p1032_p12 }
  0x41   :  { %p1035_p1 = pnand %p1034_p0, %p1028_p11 }
  0x43   :  { %1038 = shalt.err (!%p1035_p1)
}
  0x44   :  { %81 = dma.hbm_to_vmem [thread:$0]  %s1378_s4, 256, %s76_s16, [#allocation13], %s1156_s18, %s1156_s18, %s1157_s19  }
  0x45   :  { %s1047_s2 = scalar_lea.vmem %s102_s0, 256  ;;  %p1052_p3 = scmp.lt.s32.totalorder %s102_s0, %s102_s0 }
  0x46   :  { %p1048_p2 = scmp.ne.s32.totalorder %s102_s0, %s1047_s2  ;;  %p1053_p4 = scmp.lt.s32.totalorder %s1047_s2, %s1047_s2 }
  0x48   :  { %p1054_p5 = por %p1053_p4, %p1052_p3 }
  0x4a   :  { %p1055_p6 = pnand %p1054_p5, %p1048_p2 }
  0x4c   :  { %1058 = shalt.err (!%p1055_p6)
}
  0x4d   :  { %107 = dma.hbm_to_vmem [thread:$0]  %s1381_s7, 256, %s102_s0, [#allocation16], %s1156_s18, %s1156_s18, %s1157_s19  }
  0x4e   :  { %s1162_s24 = smov [#allocation18]  }
  0x4f   :  { %s113_s25 = sshll.u32 %s1162_s24, 4  ;;  %s114_s25 = int_to_ptr.vmem [resolvable:$true] %s113_s25 }
  0x50   :  { %s1067_s26 = scalar_lea.vmem %s114_s25, 256  ;;  %p1072_p8 = scmp.lt.s32.totalorder %s114_s25, %s114_s25 }
  0x51   :  { %p1068_p7 = scmp.ne.s32.totalorder %s114_s25, %s1067_s26  ;;  %p1073_p9 = scmp.lt.s32.totalorder %s1067_s26, %s1067_s26 }
  0x53   :  { %p1074_p10 = por %p1073_p9, %p1072_p8 }
  0x55   :  { %p1075_p11 = pnand %p1074_p10, %p1068_p7 }
  0x57   :  { %1078 = shalt.err (!%p1075_p11)
}
  0x58   :  { %119 = dma.hbm_to_vmem [thread:$0]  %s1382_s8, 256, %s114_s25, [#allocation19], %s1156_s18, %s1156_s18, %s1157_s19  }
  0x59   :  { %1139 = dma.done.wait [#allocation7], 32  }
  0x5a   :  { %1140 = vsyncadd [#allocation7], 4294967264 }
  0x5b   :  { %1141 = dma.done.wait [#allocation10], 160  }
  0x5c   :  { %1142 = vsyncadd [#allocation10], 4294967136 }
  0x5d   :  { %1143 = dma.done.wait [#allocation13], 384  }
  0x5e   :  { %1144 = vsyncadd [#allocation13], 4294966912 }
  0x5f   :  { %1145 = dma.done.wait [#allocation16], 512  }
  0x60   :  { %1146 = vsyncadd [#allocation16], 4294966784 }
  0x61   :  { %1147 = dma.done.wait [#allocation19], 256  }
  0x62   :  { %1148 = vsyncadd [#allocation19], 4294967040  ;;  %vm157_vm0 = vcmask 254976   ;;  %v1163_v0 = vmov 0.0   ;;  %vm1164_vm1 = vmmov 0   ;;  %v899_v1 = vld [vmem:[#allocation14 + $0x8] sm:$0xff]   ;;  %v240_v5 = vlaneseq }
  0x63   :  { %833 = vmatprep.subr.bf16.mxu0 %v1163_v0  ;;  %837 = vmatprep.mubr.msk.bf16.mxu0 %vm1164_vm1, %v1163_v0  ;;  %158 = vst.msk [vmem:[#allocation5] sm:$0x3] %vm157_vm0, %v1163_v0  ;;  %v900_v2 = vld [vmem:[#allocation14] sm:$0xff]   ;;  %v1293_v3 = vld [vmem:[#allocation9] sm:$0x3]  ;;  %vm176_vm2 = vcmask 261120  }
  0x64   :  { %841 = vmatprep.subr.bf16.mxu1 %v1163_v0  ;;  %843 = vmatprep.mubr.msk.bf16.mxu1 %vm1164_vm1, %v1163_v0  ;;  %v1298_v4 = vpack.c.bf16 %v1293_v3, %v1293_v3  ;;  %v241_v6 = vshrl.u32 %v240_v5, 7  ;;  %v283_v7 = vand.u32 127, %v240_v5  ;;  %v1165_v9 = vmov 1966171168   ;;  %v814_v17 = vld [vmem:[#allocation12] sm:$0xff]   ;;  %s1169_s29 = smov 32  }
  0x65   :  { %834 = vmatpush3.bf16.msra.mxu0 %v899_v1  ;;  %v238_v10 = vunpack.c.l.s4 %v1165_v9  ;;  %v815_v20 = vunpack.c.l.bf16 %v814_v17  ;;  %v816_v24 = vunpack.c.h.bf16 %v814_v17  ;;  %v798_v28 = vld [vmem:[%s1379_s5] ss:$0 sm:$0xff]  ;;  %vm154_vm3 = vcmask 1024   ;;  %v221_v50 = vld [vmem:[#allocation11] sm:$0xf]  ;;  %v901_v9 = vld [vmem:[#allocation17 + $0x8] sm:$0xff]  }
  0x66   :  { %835 = vmatprep.subr.bf16.mxu0 %v1163_v0  ;;  %v291_v8 = vsub.s32 %v283_v7, %v241_v6  ;;  %v253_v18 = vsub.s32 0, %v241_v6  ;;  %v1166_v36 = vmov -inf   ;;  %156 = vst.msk [vmem:[#allocation4] sm:$0x3] %vm154_vm3, %v1163_v0  ;;  %vm297_vm4 = vcmask 1041409  }
  0x67   :  { %v239_v12 = vunpack.c.0.s8 %v238_v10  ;;  %155 = vst.msk [vmem:[#allocation3] sm:$0x3] %vm154_vm3, %v1166_v36  ;;  %vm286_vm5 = vcmp.lt.s32.totalorder %v283_v7, 8  ;;  %vm301_vm6 = vcmask 58368   ;;  %v1167_v44 = vmov 0   ;;  %v902_v10 = vld [vmem:[#allocation15 + $0x8] sm:$0xff]  }
  0x68   :  { %897 = vset.pattern.permute.xlu1 %v1167_v44  ;;  %898 = vset.pattern.permute.xlu0 %v1167_v44  ;;  %vm358_vm7 = vcmask 1043456   ;;  %v222_v59 = vld [vmem:[#allocation11 + $0x4] sm:$0xf]  ;;  %vm354_vm8 = vcmask 64512  }
  0x69   :  { %836 = vmatpush3.bf16.msra.mxu0 %v900_v2  ;;  %v1306_v15 = vsub.s32 %v239_v12, %v241_v6  ;;  %v360_v51 = vsel %vm358_vm7, %v221_v50, 0  ;;  %v406_v61 = vsel %vm358_vm7, %v222_v59, 0  ;;  %v904_v12 = vld [vmem:[#allocation15] sm:$0xff]  }
  0x6a   :  { %853 = vmatprep.subr.bf16.mxu0 %v1163_v0  ;;  %842 = vmatpush3.bf16.msra.mxu1 %v360_v51  ;;  %v807_v51 = vld [vmem:[%s1383_s9] ss:$0 sm:$0xff]  ;;  %s1170_s9 = smov [#allocation20]  }
  0x6b   :  { %847 = vmatprep.subr.bf16.mxu1 %v1163_v0  ;;  %s754_s30 = sshll.u32 %s1170_s9, 4  ;;  %s755_s30 = int_to_ptr.vmem [resolvable:$true] %s754_s30 }
  0x6c   :  { %838 = vmatmul.mubr.msk.bf16.vlgmr.msra.gmra.mxu0 %vm176_vm2, %v1298_v4  ;;  %s1079_s6 = scalar_lea.vmem %s755_s30, 32  ;;  %p1084_p13 = scmp.lt.s32.totalorder %s755_s30, %s755_s30 }
  0x6d   :  { %857 = vmatprep.mubr.msk.bf16.mxu0 %vm1164_vm1, %v1163_v0  ;;  %v319_v5 = vld [vmem:[#allocation4] sm:$0x3]  ;;  %854 = vmatpush3.bf16.msra.mxu0 %v901_v9  ;;  %p1080_p12 = scmp.ne.s32.totalorder %s755_s30, %s1079_s6  ;;  %p1085_p0 = scmp.lt.s32.totalorder %s1079_s6, %s1079_s6 }
  0x6e   :  { %v303_v45 = vld [vmem:[#allocation3] sm:$0x3]  ;;  %855 = vmatprep.subr.bf16.mxu0 %v1163_v0 }
  0x6f   :  { %p1086_p1 = por %p1085_p0, %p1084_p13 }
  0x71   :  { %p1087_p2 = pnand %p1086_p1, %p1080_p12 }
 0x12c   :  { %v214_v11 = vpop.f32.mrf.mxu0 }
 0x12d   :  { %220 = vst.msk [vmem:[#allocation2] sm:$0x3] %vm157_vm0, %v214_v11  ;;  %v903_v11 = vld [vmem:[#allocation17] sm:$0xff]  }
 0x12e   :  { %v839_v13 = vpop.f32.mrf.mxu0  ;;  %856 = vmatpush3.bf16.msra.mxu0 %v903_v11 }
 0x12f   :  { %869 = vmatprep.subr.bf16.mxu0 %v1163_v0 }
 0x130   :  { %v217_v14 = vpop.f32.mrf.mxu0 }
 0x131   :  { %v476_v14 = vld [vmem:[#allocation6] sm:$0x3] }
 0x132   :  { %v840_v16 = vpop.f32.mrf.mxu0 }
 0x133   :  { %v477_v16 = vpack.c.bf16 %v476_v14, %v476_v14 }
 0x134   :  { %v797_v19 = vld.sshfl [vmem:[#allocation2] sm:$0x11 pattern:$0x75316420] }
 0x135   :  { %v243_v21 = vrot.slane %v797_v19, %v1306_v15  ;;  %v236_v22 = vcombine.high %v797_v19, %v797_v19 }
 0x137   :  { %v254_v23 = vrot.slane %v243_v21, %v253_v18  ;;  %v250_v25 = vrot.slane %v236_v22, %v1306_v15  ;;  %v448_v21 = vld [vmem:[#allocation5] sm:$0x3] }
 0x139   :  { %v261_v26 = vadd.f32 %v815_v20, %v254_v23  ;;  %v258_v27 = vrot.slane %v250_v25, %v253_v18 }
 0x13b   :  { %v263_v29 = vmax.f32 %v261_v26, 0.0  ;;  %v262_v30 = vadd.f32 %v816_v24, %v258_v27 }
 0x13d   :  { %v272_v31 = vmul.f32 %v798_v28, %v263_v29  ;;  %v264_v32 = vmax.f32 %v262_v30, 0.0 }
 0x13f   :  { %v275_v33 = vsel %vm176_vm2, %v272_v31, 0.0  ;;  %v273_v34 = vmul.f32 %v798_v28, %v264_v32 }
 0x140   :  { %276 = vadd.xlane.f32.xlu0 %v275_v33 }
 0x141   :  { %v278_v35 = vsel %vm176_vm2, %v273_v34, 0.0 }
 0x144   :  { %279 = vadd.xlane.f32.xlu0 %v278_v35  ;;  %v905_v35 = vld [vmem:[#allocation18 + $0x8] sm:$0xff]  }
 0x1c9   :  { %v277_v37 = vpop.xlane.xlu0 %276 }
 0x1ca   :  { %v292_v39 = vrot.slane %v277_v37, %v291_v8  ;;  %v906_v37 = vld [vmem:[#allocation18] sm:$0xff]  }
 0x1cd   :  { %v280_v38 = vpop.xlane.xlu0 %279 }
 0x1ce   :  { %v296_v40 = vrot.slane %v280_v38, %v291_v8 }
 0x1d0   :  { %v298_v41 = vsel %vm297_vm4, %v296_v40, %v292_v39 }
 0x1d1   :  { %v300_v42 = vsel %vm286_vm5, %v298_v41, -1e+30 }
 0x1d2   :  { %v304_v43 = vsel %vm301_vm6, %v300_v42, -inf  ;;  %302 = vst.msk [vmem:[#allocation20] sm:$0x3] %vm301_vm6, %v300_v42 }
 0x1d3   :  { %305 = vmax.xlane.f32.xlu1 %v304_v43 }
 0x25c   :  { %v306_v46 = vpop.xlane.xlu1 %305 }
 0x25d   :  { %v307_v47 = vmax.f32 %v303_v45, %v306_v46  ;;  %v808_v46 = vld [vmem:[%s1384_s10] ss:$0 sm:$0xff]  ;;  %s1168_s10 = smov 96  }
 0x25f   :  { %v308_v48 = vsub.f32 %v303_v45, %v307_v47  ;;  %463 = vst.msk [vmem:[#allocation3] sm:$0x3] %vm154_vm3, %v307_v47  ;;  %313 = vperm.xlu1 %897, %v307_v47  }
 0x261   :  { %v309_v49 = vmul.f32 1.442695, %v308_v48 }
 0x263   :  { %907 = vpow2.f32 %v309_v49 }
 0x270   :  { %v908_v52 = vpop.eup %907 }
 0x271   :  { %451 = vperm.xlu1 %897, %v908_v52   ;;  %v320_v6 = vmul.f32 %v908_v52, %v319_v5 }
 0x2da   :  { %v314_v53 = vpop.permute.xlu1 %313 }
 0x2db   :  { %v316_v54 = vsub.f32 %v300_v42, %v314_v53 }
 0x2dd   :  { %v317_v55 = vmul.f32 1.442695, %v316_v54 }
 0x2df   :  { %909 = vpow2.f32 %v317_v55 }
 0x2ec   :  { %v910_v56 = vpop.eup %909  ;;  %v452_v22 = vpop.permute.xlu1 %451 }
 0x2ed   :  { %v321_v57 = vsel %vm301_vm6, %v910_v56, 0.0  ;;  %v334_v58 = vrot.slane %v910_v56, %v1306_v15  ;;  %v454_v25 = vmul.f32 %v452_v22, %v448_v21 }
 0x2ee   :  { %322 = vadd.xlane.f32.xlu0 %v321_v57 }
 0x2ef   :  { %v342_v60 = vrot.slane %v334_v58, %v1306_v15  ;;  %v335_v62 = vcombine.high %v334_v58, %v334_v58 }
 0x2f1   :  { %v352_v63 = vpack.c.bf16 %v342_v60, %v342_v60  ;;  %v349_v1 = vrot.slane %v335_v62, %v1306_v15 }
 0x2f3   :  { %844 = vmatmul.mubr.msk.bf16.vlgmr.msra.gmra.mxu1 %vm354_vm8, %v352_v63  ;;  %v353_v2 = vpack.c.bf16 %v349_v1, %v349_v1 }
 0x2f4   :  { %848 = vmatpush3.bf16.msra.mxu1 %v406_v61  ;;  %849 = vmatprep.mubr.msk.bf16.mxu1 %vm1164_vm1, %v1163_v0 }
 0x2f5   :  { %861 = vmatprep.subr.bf16.mxu1 %v1163_v0 }
 0x2fb   :  { %850 = vmatmul.mubr.msk.bf16.vlgmr.msra.gmra.mxu1 %vm354_vm8, %v353_v2 }
 0x2fc   :  { %865 = vmatprep.mubr.msk.bf16.mxu1 %vm1164_vm1, %v1163_v0  ;;  %862 = vmatpush3.bf16.msra.mxu1 %v902_v10 }
 0x2fd   :  { %863 = vmatprep.subr.bf16.mxu1 %v1163_v0 }
 0x300   :  { %864 = vmatpush3.bf16.msra.mxu1 %v904_v12 }
 0x303   :  { %866 = vmatmul.mubr.msk.bf16.vlgmr.msra.gmra.mxu1 %vm176_vm2, %v477_v16 }
 0x377   :  { %v323_v7 = vpop.xlane.xlu0 %322 }
 0x378   :  { %v324_v8 = vadd.f32 %v323_v7, %v320_v6 }
 0x37a   :  { %326 = vst.msk [vmem:[#allocation4] sm:$0x3] %vm154_vm3, %v324_v8 }
 0x381   :  { %v468_v13 = vld [vmem:[#allocation4] sm:$0x3] }
 0x382   :  { %471 = vperm.xlu0 %898, %v468_v13  }
 0x3b3   :  { %v396_v17 = vpop.f32.mrf.mxu1 }
 0x3b5   :  { %v845_v18 = vpop.f32.mrf.mxu1 }
 0x3b7   :  { %v399_v19 = vpop.f32.mrf.mxu1 }
 0x3b9   :  { %v846_v20 = vpop.f32.mrf.mxu1 }
 0x3bb   :  { %v442_v23 = vpop.f32.mrf.mxu1 }
 0x3bc   :  { %v457_v24 = vrot.slane %v442_v23, 7 }
 0x3bd   :  { %v851_v26 = vpop.f32.mrf.mxu1 }
 0x3be   :  { %v458_v27 = vsel %vm297_vm4, %v457_v24, %v396_v17 }
 0x3bf   :  { %v460_v28 = vadd.f32 %v458_v27, %v454_v25  ;;  %v445_v29 = vpop.f32.mrf.mxu1 }
 0x3c1   :  { %462 = vst.msk [vmem:[#allocation5] sm:$0x3] %vm157_vm0, %v460_v28  ;;  %v852_v30 = vpop.f32.mrf.mxu1 }
 0x3c3   :  { %v591_v38 = vpop.f32.mrf.mxu1 }
 0x3c5   :  { %v867_v39 = vpop.f32.mrf.mxu1 }
 0x3c7   :  { %v594_v40 = vpop.f32.mrf.mxu1 }
 0x3c8   :  { %v467_v33 = vld [vmem:[#allocation5] sm:$0x3] }
 0x3c9   :  { %v868_v41 = vpop.f32.mrf.mxu1 }
 0x3fd   :  { %v472_v31 = vpop.permute.xlu0 %471 }
 0x3fe   :  { %911 = vrcp.f32 %v472_v31 }
 0x40b   :  { %v912_v32 = vpop.eup %911 }
 0x40c   :  { %v475_v34 = vmul.f32 %v912_v32, %v467_v33 }
 0x40e   :  { %v1341_v36 = vpack.c.bf16 %v475_v34, %v475_v34 }
 0x410   :  { %858 = vmatmul.mubr.msk.bf16.vlgmr.msra.gmra.mxu0 %vm176_vm2, %v1341_v36 }
 0x411   :  { %870 = vmatpush3.bf16.msra.mxu0 %v905_v35  ;;  %873 = vmatprep.mubr.msk.bf16.mxu0 %vm1164_vm1, %v1163_v0 }
 0x412   :  { %871 = vmatprep.subr.bf16.mxu0 %v1163_v0 }
 0x415   :  { %872 = vmatpush3.bf16.msra.mxu0 %v906_v37 }
 0x418   :  { %874 = vmatmul.mubr.msk.bf16.vlgmr.msra.gmra.mxu0 %vm176_vm2, %v1298_v4 }
 0x4d0   :  { %v536_v42 = vpop.f32.mrf.mxu0 }
 0x4d1   :  { %v592_v4 = vadd.f32 %v591_v38, %v536_v42 }
 0x4d2   :  { %v859_v43 = vpop.f32.mrf.mxu0 }
 0x4d3   :  { %v604_v52 = vadd.f32 %v807_v51, %v592_v4 }
 0x4d4   :  { %v539_v44 = vpop.f32.mrf.mxu0 }
 0x4d6   :  { %v860_v45 = vpop.f32.mrf.mxu0 }
 0x4d8   :  { %v666_v47 = vpop.f32.mrf.mxu0 }
 0x4d9   :  { %v667_v48 = vadd.f32 %v808_v46, %v666_v47 }
 0x4da   :  { %v875_v49 = vpop.f32.mrf.mxu0 }
 0x4db   :  { %680 = vrot.lane.b32.xlu1 %v667_v48, %s1156_s18  ;;  %v672_v53 = vadd.f32 %v667_v48, %v604_v52 }
 0x4dc   :  { %v669_v0 = vpop.f32.mrf.mxu0 }
 0x4dd   :  { %v812_v54 = vmul.f32 -1.442695, %v672_v53 }
 0x4de   :  { %v876_v50 = vpop.f32.mrf.mxu0 }
 0x4df   :  { %913 = vpow2.f32 %v812_v54 }
 0x4ec   :  { %v914_v55 = vpop.eup %913 }
 0x4ed   :  { %v676_v56 = vadd.f32 1.0, %v914_v55 }
 0x4ef   :  { %915 = vrcp.f32 %v676_v56 }
 0x4fc   :  { %v916_v57 = vpop.eup %915 }
 0x4fd   :  { %v690_v1 = vsub.f32 1.0, %v916_v57 }
 0x54d   :  { %v681_v58 = vpop.permute.xlu1 %680 }
 0x54e   :  { %v683_v59 = vmul.f32 %v916_v57, %v681_v58 }
 0x550   :  { %685 = vrot.lane.b32.xlu1 %v683_v59, %s1156_s18 }
 0x5c2   :  { %v686_v60 = vpop.permute.xlu1 %685 }
 0x5c3   :  { %v688_v61 = vadd.f32 %v686_v60, %v604_v52 }
 0x5c5   :  { %917 = vtanh.f32 %v688_v61 }
 0x5d2   :  { %v918_v62 = vpop.eup %917 }
 0x5d3   :  { %692 = vrot.lane.b32.xlu1 %v918_v62, %s1168_s10 }
 0x5d7   :  { %697 = vrot.lane.b32.xlu1 %v1293_v3, %s1169_s29 }
 0x645   :  { %v693_v63 = vpop.permute.xlu1 %692 }
 0x646   :  { %v695_v5 = vmul.f32 %v693_v63, %v690_v1 }
 0x649   :  { %v698_v2 = vpop.permute.xlu1 %697 }
 0x64a   :  { %v700_v6 = vmul.f32 %v916_v57, %v698_v2 }
 0x64c   :  { %v701_v7 = vadd.f32 %v700_v6, %v695_v5 }
 0x64d   :  { %1090 = shalt.err (!%p1087_p2)
}
 0x64e   :  { %757 = dma.vmem_to_hbm [thread:$0]  %s755_s30, 32, %s1385_s11, [#allocation8]   ;;  %v707_v3 = vpack.c.bf16 %v701_v7, %v701_v7  ;;  %703 = vrot.lane.b32.xlu1 %v701_v7, %s1168_s10  ;;  %v735_v10 = vrot.slane %v1341_v36, %v1306_v15 }
 0x64f   :  { %s1171_s15 = smov [#allocation21]  }
 0x650   :  { %v715_v8 = vrot.slane %v707_v3, %v1306_v15  ;;  %v742_v11 = vrot.slane %v735_v10, %v1306_v15  ;;  %s764_s16 = sshll.u32 %s1171_s15, 4  ;;  %s765_s16 = int_to_ptr.vmem [resolvable:$true] %s764_s16 }
 0x651   :  { %s1099_s11 = scalar_lea.vmem %s765_s16, 32  ;;  %p1104_p4 = scmp.lt.s32.totalorder %s765_s16, %s765_s16 }
 0x652   :  { %v722_v9 = vrot.slane %v715_v8, %v1306_v15  ;;  %p1100_p3 = scmp.ne.s32.totalorder %s765_s16, %s1099_s11  ;;  %p1105_p5 = scmp.lt.s32.totalorder %s1099_s11, %s1099_s11 }
 0x654   :  { %723 = vrot.lane.b32.xlu1 %v722_v9, %s1168_s10  ;;  %p1106_p6 = por %p1105_p5, %p1104_p4 }
 0x656   :  { %p1107_p7 = pnand %p1106_p6, %p1100_p3 }
 0x658   :  { %743 = vrot.lane.b32.xlu1 %v742_v11, %s1169_s29 }
 0x6c0   :  { %v704_v12 = vpop.permute.xlu1 %703 }
 0x6c1   :  { %706 = vst.msk [vmem:[#allocation21] sm:$0x3] %vm157_vm0, %v704_v12 }
 0x6c2   :  { %1110 = shalt.err (!%p1107_p7)
}
 0x6c3   :  { %767 = dma.vmem_to_hbm [thread:$0]  %s765_s16, 32, %s1386_s12, [#allocation22]   ;;  %vm726_vm9 = vcmask 253952   ;;  %vm746_vm10 = vcmask 516352  }
 0x6c4   :  { %s1172_s20 = smov [#allocation23]  }
 0x6c5   :  { %s774_s21 = sshll.u32 %s1172_s20, 4  ;;  %s775_s21 = int_to_ptr.vmem [resolvable:$true] %s774_s21 }
 0x6c6   :  { %v724_v15 = vpop.permute.xlu1 %723  ;;  %s1119_s1 = scalar_lea.vmem %s775_s21, 16  ;;  %s1123_s2 = scalar_lea.vmem %s775_s21, 32 }
 0x6c7   :  { %727 = vst.msk [vmem:[#allocation23] sm:$0x1] %vm726_vm9, %v724_v15  ;;  %p1120_p8 = scmp.ne.s32.totalorder %s775_s21, %s1119_s1  ;;  %p1124_p9 = scmp.lt.s32.totalorder %s775_s21, %s775_s21 }
 0x6c8   :  { %p1125_p10 = scmp.lt.s32.totalorder %s1123_s2, %s1119_s1 }
 0x6ca   :  { %v744_v13 = vpop.permute.xlu1 %743  ;;  %p1126_p11 = por %p1125_p10, %p1124_p9 }
 0x6cb   :  { %747 = vst.msk [vmem:[#allocation23] sm:$0x1] %vm746_vm10, %v744_v13 }
 0x6cc   :  { %p1127_p12 = pnand %p1126_p11, %p1120_p8 }
 0x6ce   :  { %1130 = shalt.err (!%p1127_p12)
}
 0x6cf   :  { %777 = dma.vmem_to_hbm [thread:$0]  %s775_s21, 16, %s1387_s13, [#allocation22]  }
 0x6d0   :  { %1149 = dma.done.wait [#allocation8], 32  }
 0x6d1   :  { %1150 = vsyncadd [#allocation8], 4294967264 }
 0x6d2   :  { %1151 = dma.done.wait [#allocation22], 48  }
 0x6d3   :  { %1152 = vsyncadd [#allocation22], 4294967248 }
 0x6d4   :  { %787 = vsyncpa [#allocation7], 1 }
 0x6d5   :  { %788 = vsyncpa [#allocation10], 1 }
 0x6d6   :  { %789 = vsyncpa [#allocation13], 1 }
 0x6d7   :  { %790 = vsyncpa [#allocation16], 1 }
 0x6d8   :  { %791 = vsyncpa [#allocation19], 1 }
 0x6d9   :  { %792 = vsyncpa [#allocation8], 1 }
 0x6da   :  { %793 = vsyncpa [#allocation22], 1 }

</bundles_post_ra>
